<compile_context>
chip_gen: v7x
topology: tpu7x:2x2x1
jax: 0.10.0
libtpu: 0.0.40
codegen_flags: <defaults>
</compile_context>

<pallas_src>
import jax
import jax.numpy as jnp
from jax.experimental import pallas as pl
from jax.experimental.pallas import tpu as pltpu

# Whole-array blocks resident in VMEM (all operands are tiny: W1 bf16 393 KiB dominates).
VMEM_SPEC = pl.BlockSpec(memory_space=pltpu.MemorySpace.VMEM)

EPS = 0.001  # entropy epsilon, matches torch: -sum(p * log(p + 1e-3)), clamped at 0


# ---------------------------------------------------------------------------
# Fused kernel.
#
# Inputs  : x [N, D] (support rows first), W1 [D, H] (bf16), b1 [1, H],
#           W2 [H, NW], b2 [1, NW]
# Outputs : logits [N, NW]  (classification_logits of the torch module)
#           comb   [S, Q]   (torch `combined_similarity`, already in [S, Q] layout)
# ---------------------------------------------------------------------------
def _fused_kernel(x_ref, w1_ref, b1_ref, w2_ref, b2_ref, logits_ref, comb_ref):
    S = comb_ref.shape[0]                 # support rows
    nway = w2_ref.shape[1]
    kshot = S // nway

    x = x_ref[...]                        # [N, D] f32

    # ---- classification head on the FULL batch (one matmul pair, bf16 weights) ----
    h = jnp.dot(x.astype(w1_ref.dtype), w1_ref[...],
                preferred_element_type=jnp.float32) + b1_ref[...]
    h = jnp.maximum(h, 0.0)                                            # [N, H] f32
    logits = jnp.dot(h, w2_ref[...],
                     preferred_element_type=jnp.float32) + b2_ref[...]  # [N, NW]
    logits_ref[...] = logits

    s = x[:S]                             # [S, D] support rows
    q = x[S:]                             # [Q, D] query rows
    logits_q = logits[S:]                 # [Q, NW]

    # ---- pairwise (shifted) squared Euclidean distance, [S, Q] layout ----
    # The softmax over the support axis is invariant to the per-query ||q||^2 term,
    # so it is dropped; only ||s||^2 - 2 s.q survives (mathematically identical sim).
    s_sq = jnp.sum(s * s, axis=1, keepdims=True)                       # [S, 1]
    cross = jax.lax.dot_general(
        s, q, dimension_numbers=(((1,), (1,)), ((), ())),
        preferred_element_type=jnp.float32)                            # [S, Q] = s.q
    neg = 2.0 * cross - s_sq                                           # = -(dist - ||q||^2)

    # ---- similarity softmax + entropy over the support axis (axis 0) ----
    m = jnp.max(neg, axis=0, keepdims=True)                            # [1, Q]
    e = jnp.exp(neg - m)
    sim = e / jnp.sum(e, axis=0, keepdims=True)                        # [S, Q]
    sim_ent = jnp.maximum(
        -jnp.sum(sim * jnp.log(sim + EPS), axis=0, keepdims=True), 0.0)  # [1, Q]

    # ---- classification softmax for query rows ----
    lm = jnp.max(logits_q, axis=1, keepdims=True)
    le = jnp.exp(logits_q - lm)
    probs = le / jnp.sum(le, axis=1, keepdims=True)                    # [Q, NW]

    # ---- kshot-expanded class probabilities via one tiny matmul ----
    # expand_t[s, c] = 1 iff support row s belongs to class c  (s // kshot == c)
    r = jax.lax.broadcasted_iota(jnp.int32, (S, nway), 0)
    c = jax.lax.broadcasted_iota(jnp.int32, (S, nway), 1)
    expand_t = ((r >= c * kshot) & (r < (c + 1) * kshot)).astype(jnp.float32)  # [S, NW]
    exp_sq = jax.lax.dot_general(
        expand_t, probs, dimension_numbers=(((1,), (1,)), ((), ())),
        preferred_element_type=jnp.float32)                            # [S, Q]
    exp_ent = jnp.maximum(
        -jnp.sum(exp_sq * jnp.log(exp_sq + EPS), axis=0, keepdims=True), 0.0)  # [1, Q]

    # combined similarity, directly in the torch [S, Q] layout
    comb_ref[...] = exp_sq / (1.0 + exp_ent) + sim / (1.0 + sim_ent)


def fused_sampler_head(x, w1, b1, w2, b2, support_size):
    N = x.shape[0]
    nway = w2.shape[1]
    Q = N - support_size
    return pl.pallas_call(
        _fused_kernel,
        out_shape=(
            jax.ShapeDtypeStruct((N, nway), jnp.float32),        # classification logits
            jax.ShapeDtypeStruct((support_size, Q), jnp.float32),  # combined similarity
        ),
        in_specs=[VMEM_SPEC] * 5,
        out_specs=(VMEM_SPEC, VMEM_SPEC),
    )(x, w1, b1.reshape(1, -1), w2, b2.reshape(1, -1))


# ---------------------------------------------------------------------------
# Full MyModel.forward (minus the text->embedding BERT front-end)
# ---------------------------------------------------------------------------
def my_model_forward(text_embeddings, params, cfg):
    nway = cfg["numNWay"]
    kshot = cfg["numKShot"]
    qshot = cfg["numQShot"]
    topk = cfg["k"]
    support_size = nway * kshot
    D = text_embeddings.shape[1]

    # single fused Pallas kernel: batched MLP head + distance + softmax/entropy combine
    logits, combined_sq = fused_sampler_head(
        text_embeddings, params["w1"], params["b1"], params["w2"], params["b2"],
        support_size)                                              # [N,NW], [S,Q]

    support = text_embeddings[:support_size]                       # [S, D]
    query = text_embeddings[support_size:]                         # [Q, D]

    class_protos = support.reshape(nway, kshot, D)                  # [NW, K, D]
    original_prototypes = jnp.mean(class_protos, axis=1)            # [NW, D]

    combined = combined_sq.reshape(nway, kshot, -1)                 # [NW, K, Q]
    top_vals, top_idx = jax.lax.top_k(combined, topk)               # [NW, K, topk]

    # top-k accuracy
    class_ids = jnp.arange(nway)[:, None, None]
    lo = class_ids * qshot
    hi = (class_ids + 1) * qshot - 1
    correct = jnp.sum((top_idx >= lo) & (top_idx <= hi), axis=2).astype(jnp.float32)
    accuracy = jnp.mean(correct / float(topk))

    # gather selected query features (glue: data-dependent gather stays in XLA)
    flat_idx = top_idx.reshape(-1, topk)                            # [NW*K, topk]
    selected = query[flat_idx]                                      # [NW*K, topk, D]
    sampled_data = selected.reshape(nway, kshot * topk, D)          # [NW, K*topk, D]

    combined_protos = jnp.concatenate([class_protos, sampled_data], axis=1)
    final_prototypes = jnp.mean(combined_protos, axis=1)            # [NW, D]

    return (final_prototypes, query, accuracy,
            original_prototypes, sampled_data, logits)


if __name__ == "__main__":
    cfg = dict(numNWay=5, numKShot=2, numQShot=4, k=3)
    D = 768                                   # hardcoded 768 in the PyTorch module
    n_total = cfg["numNWay"] * (cfg["numKShot"] + cfg["numQShot"])   # 30 rows

    key = jax.random.PRNGKey(0)
    k1, k2, k3 = jax.random.split(key, 3)

    # precomputed "BERT [CLS]" embeddings stand in for the text encoder output
    x = jax.random.normal(k1, (n_total, D), dtype=jnp.float32)

    params = {
        # W1 stored bf16 (dominant HBM traffic); matmul accumulates in f32.
        "w1": (0.02 * jax.random.normal(k2, (D, 256), dtype=jnp.float32)
               ).astype(jnp.bfloat16),
        "b1": jnp.zeros((256,), jnp.float32),
        "w2": 0.02 * jax.random.normal(k3, (256, cfg["numNWay"]), dtype=jnp.float32),
        "b2": jnp.zeros((cfg["numNWay"],), jnp.float32),
    }

    fwd = jax.jit(lambda emb, p: my_model_forward(emb, p, cfg))
    outs = fwd(x, params)
    jax.block_until_ready(outs)

    # light sanity checks on shapes / values
    final_protos, query, acc, orig_protos, sampled, logits = outs
    assert final_protos.shape == (cfg["numNWay"], D)
    assert query.shape == (cfg["numNWay"] * cfg["numQShot"], D)
    assert orig_protos.shape == (cfg["numNWay"], D)
    assert sampled.shape == (cfg["numNWay"], cfg["numKShot"] * cfg["k"], D)
    assert logits.shape == (n_total, cfg["numNWay"])
    assert bool(jnp.isfinite(acc)) and 0.0 <= float(acc) <= 1.0
    assert bool(jnp.all(jnp.isfinite(final_protos)))
    assert bool(jnp.all(jnp.isfinite(logits)))

    print("KERNEL_OK")
</pallas_src>

<mosaic_0001>
module attributes {stable_mosaic.version = 11 : i64} {
  func.func @_fused_kernel(%arg0: memref<30x768xf32, #tpu.memory_space<vmem>>, %arg1: memref<768x256xbf16, #tpu.memory_space<vmem>>, %arg2: memref<1x256xf32, #tpu.memory_space<vmem>>, %arg3: memref<256x5xf32, #tpu.memory_space<vmem>>, %arg4: memref<1x5xf32, #tpu.memory_space<vmem>>, %arg5: memref<30x5xf32, #tpu.memory_space<vmem>>, %arg6: memref<10x20xf32, #tpu.memory_space<vmem>>) attributes {dimension_semantics = [], scalar_prefetch = 0 : i64, scratch_operands = 0 : i64, tpu.core_type = #tpu.core_type<tc>} {
    %c0 = arith.constant 0 : index
    %c0_0 = arith.constant 0 : index
    %0 = vector.load %arg0[%c0, %c0_0] : memref<30x768xf32, #tpu.memory_space<vmem>>, vector<30x768xf32>
    %1 = arith.truncf %0 : vector<30x768xf32> to vector<30x768xbf16>
    %c0_1 = arith.constant 0 : index
    %c0_2 = arith.constant 0 : index
    %2 = vector.load %arg1[%c0_1, %c0_2] : memref<768x256xbf16, #tpu.memory_space<vmem>>, vector<768x256xbf16>
    %cst = arith.constant dense<0.000000e+00> : vector<30x256xf32>
    %3 = tpu.matmul %1, %2, %cst {dimension_numbers = #tpu.dot_dimension_numbers<[1], [0], [0], [1], [0, 0, 1, 1], [], []>} : vector<30x768xbf16>, vector<768x256xbf16>, vector<30x256xf32> -> vector<30x256xf32>
    %c0_3 = arith.constant 0 : index
    %c0_4 = arith.constant 0 : index
    %4 = vector.load %arg2[%c0_3, %c0_4] : memref<1x256xf32, #tpu.memory_space<vmem>>, vector<1x256xf32>
    %5 = vector.broadcast %4 : vector<1x256xf32> to vector<30x256xf32>
    %6 = arith.addf %3, %5 : vector<30x256xf32>
    %cst_5 = arith.constant 0.000000e+00 : f32
    %7 = vector.broadcast %cst_5 : f32 to vector<30x256xf32>
    %8 = arith.maximumf %6, %7 : vector<30x256xf32>
    %c0_6 = arith.constant 0 : index
    %c0_7 = arith.constant 0 : index
    %9 = vector.load %arg3[%c0_6, %c0_7] : memref<256x5xf32, #tpu.memory_space<vmem>>, vector<256x5xf32>
    %cst_8 = arith.constant dense<0.000000e+00> : vector<30x5xf32>
    %10 = tpu.matmul %8, %9, %cst_8 {dimension_numbers = #tpu.dot_dimension_numbers<[1], [0], [0], [1], [0, 0, 1, 1], [], []>} : vector<30x256xf32>, vector<256x5xf32>, vector<30x5xf32> -> vector<30x5xf32>
    %c0_9 = arith.constant 0 : index
    %c0_10 = arith.constant 0 : index
    %11 = vector.load %arg4[%c0_9, %c0_10] : memref<1x5xf32, #tpu.memory_space<vmem>>, vector<1x5xf32>
    %12 = vector.broadcast %11 : vector<1x5xf32> to vector<30x5xf32>
    %13 = arith.addf %10, %12 : vector<30x5xf32>
    %c0_11 = arith.constant 0 : index
    %c0_12 = arith.constant 0 : index
    %14 = vector.load %arg5[%c0_11, %c0_12] : memref<30x5xf32, #tpu.memory_space<vmem>>, vector<30x5xf32>
    tpu.vector_store %arg5[%c0_11, %c0_12], %13 {strides = array<i32>} : memref<30x5xf32, #tpu.memory_space<vmem>>, vector<30x5xf32>,
    %15 = vector.extract_strided_slice %0 {offsets = [0, 0], sizes = [10, 768], strides = [1, 1]} : vector<30x768xf32> to vector<10x768xf32>
    %16 = vector.extract_strided_slice %0 {offsets = [10, 0], sizes = [20, 768], strides = [1, 1]} : vector<30x768xf32> to vector<20x768xf32>
    %17 = vector.extract_strided_slice %13 {offsets = [10, 0], sizes = [20, 5], strides = [1, 1]} : vector<30x5xf32> to vector<20x5xf32>
    %18 = arith.mulf %15, %15 : vector<10x768xf32>
    %cst_13 = arith.constant dense<0.000000e+00> : vector<10xf32>
    %19 = vector.multi_reduction <add>, %18, %cst_13 [1] : vector<10x768xf32> to vector<10xf32>
    %20 = vector.shape_cast %19 : vector<10xf32> to vector<10x1xf32>
    %cst_14 = arith.constant dense<0.000000e+00> : vector<10x20xf32>
    %21 = tpu.matmul %15, %16, %cst_14 {dimension_numbers = #tpu.dot_dimension_numbers<[1], [1], [0], [0], [0, 0, 1, 0], [], []>} : vector<10x768xf32>, vector<20x768xf32>, vector<10x20xf32> -> vector<10x20xf32>
    %cst_15 = arith.constant 2.000000e+00 : f32
    %22 = vector.broadcast %cst_15 : f32 to vector<10x20xf32>
    %23 = arith.mulf %22, %21 : vector<10x20xf32>
    %24 = vector.broadcast %20 : vector<10x1xf32> to vector<10x20xf32>
    %25 = arith.subf %23, %24 : vector<10x20xf32>
    %cst_16 = arith.constant dense<0xFF800000> : vector<20xf32>
    %26 = vector.multi_reduction <maximumf>, %25, %cst_16 [0] : vector<10x20xf32> to vector<20xf32>
    %27 = vector.shape_cast %26 : vector<20xf32> to vector<1x20xf32>
    %28 = vector.broadcast %27 : vector<1x20xf32> to vector<10x20xf32>
    %29 = arith.subf %25, %28 : vector<10x20xf32>
    %30 = math.exp %29 : vector<10x20xf32>
    %cst_17 = arith.constant dense<0.000000e+00> : vector<20xf32>
    %31 = vector.multi_reduction <add>, %30, %cst_17 [0] : vector<10x20xf32> to vector<20xf32>
    %32 = vector.shape_cast %31 : vector<20xf32> to vector<1x20xf32>
    %33 = vector.broadcast %32 : vector<1x20xf32> to vector<10x20xf32>
    %34 = arith.divf %30, %33 : vector<10x20xf32>
    %cst_18 = arith.constant 1.000000e-03 : f32
    %35 = vector.broadcast %cst_18 : f32 to vector<10x20xf32>
    %36 = arith.addf %34, %35 : vector<10x20xf32>
    %37 = math.log %36 : vector<10x20xf32>
    %38 = arith.mulf %34, %37 : vector<10x20xf32>
    %cst_19 = arith.constant dense<0.000000e+00> : vector<20xf32>
    %39 = vector.multi_reduction <add>, %38, %cst_19 [0] : vector<10x20xf32> to vector<20xf32>
    %40 = vector.shape_cast %39 : vector<20xf32> to vector<1x20xf32>
    %cst_20 = arith.constant 0.000000e+00 : f32
    %41 = vector.broadcast %cst_20 : f32 to vector<1x20xf32>
    %42 = arith.subf %41, %40 : vector<1x20xf32>
    %cst_21 = arith.constant 0.000000e+00 : f32
    %43 = vector.broadcast %cst_21 : f32 to vector<1x20xf32>
    %44 = arith.maximumf %42, %43 : vector<1x20xf32>
    %cst_22 = arith.constant dense<0xFF800000> : vector<20xf32>
    %45 = vector.multi_reduction <maximumf>, %17, %cst_22 [1] : vector<20x5xf32> to vector<20xf32>
    %46 = vector.shape_cast %45 : vector<20xf32> to vector<20x1xf32>
    %47 = vector.broadcast %46 : vector<20x1xf32> to vector<20x5xf32>
    %48 = arith.subf %17, %47 : vector<20x5xf32>
    %49 = math.exp %48 : vector<20x5xf32>
    %cst_23 = arith.constant dense<0.000000e+00> : vector<20xf32>
    %50 = vector.multi_reduction <add>, %49, %cst_23 [1] : vector<20x5xf32> to vector<20xf32>
    %51 = vector.shape_cast %50 : vector<20xf32> to vector<20x1xf32>
    %52 = vector.broadcast %51 : vector<20x1xf32> to vector<20x5xf32>
    %53 = arith.divf %49, %52 : vector<20x5xf32>
    %54 = tpu.iota {dimensions = array<i32: 0>} : vector<10x5xi32>
    %55 = tpu.iota {dimensions = array<i32: 1>} : vector<10x5xi32>
    %c2_i32 = arith.constant 2 : i32
    %56 = vector.broadcast %c2_i32 : i32 to vector<10x5xi32>
    %57 = arith.muli %55, %56 : vector<10x5xi32>
    %58 = arith.cmpi sge, %54, %57 : vector<10x5xi32>
    %c1_i32 = arith.constant 1 : i32
    %59 = vector.broadcast %c1_i32 : i32 to vector<10x5xi32>
    %60 = arith.addi %55, %59 : vector<10x5xi32>
    %c2_i32_24 = arith.constant 2 : i32
    %61 = vector.broadcast %c2_i32_24 : i32 to vector<10x5xi32>
    %62 = arith.muli %60, %61 : vector<10x5xi32>
    %63 = arith.cmpi slt, %54, %62 : vector<10x5xi32>
    %64 = arith.andi %58, %63 : vector<10x5xi1>
    %65 = arith.extui %64 : vector<10x5xi1> to vector<10x5xi32>
    %66 = arith.sitofp %65 : vector<10x5xi32> to vector<10x5xf32>
    %cst_25 = arith.constant dense<0.000000e+00> : vector<10x20xf32>
    %67 = tpu.matmul %66, %53, %cst_25 {dimension_numbers = #tpu.dot_dimension_numbers<[1], [1], [0], [0], [0, 0, 1, 0], [], []>} : vector<10x5xf32>, vector<20x5xf32>, vector<10x20xf32> -> vector<10x20xf32>
    %cst_26 = arith.constant 1.000000e-03 : f32
    %68 = vector.broadcast %cst_26 : f32 to vector<10x20xf32>
    %69 = arith.addf %67, %68 : vector<10x20xf32>
    %70 = math.log %69 : vector<10x20xf32>
    %71 = arith.mulf %67, %70 : vector<10x20xf32>
    %cst_27 = arith.constant dense<0.000000e+00> : vector<20xf32>
    %72 = vector.multi_reduction <add>, %71, %cst_27 [0] : vector<10x20xf32> to vector<20xf32>
    %73 = vector.shape_cast %72 : vector<20xf32> to vector<1x20xf32>
    %cst_28 = arith.constant 0.000000e+00 : f32
    %74 = vector.broadcast %cst_28 : f32 to vector<1x20xf32>
    %75 = arith.subf %74, %73 : vector<1x20xf32>
    %cst_29 = arith.constant 0.000000e+00 : f32
    %76 = vector.broadcast %cst_29 : f32 to vector<1x20xf32>
    %77 = arith.maximumf %75, %76 : vector<1x20xf32>
    %cst_30 = arith.constant 1.000000e+00 : f32
    %78 = vector.broadcast %cst_30 : f32 to vector<1x20xf32>
    %79 = arith.addf %78, %77 : vector<1x20xf32>
    %80 = vector.broadcast %79 : vector<1x20xf32> to vector<10x20xf32>
    %81 = arith.divf %67, %80 : vector<10x20xf32>
    %cst_31 = arith.constant 1.000000e+00 : f32
    %82 = vector.broadcast %cst_31 : f32 to vector<1x20xf32>
    %83 = arith.addf %82, %44 : vector<1x20xf32>
    %84 = vector.broadcast %83 : vector<1x20xf32> to vector<10x20xf32>
    %85 = arith.divf %34, %84 : vector<10x20xf32>
    %86 = arith.addf %81, %85 : vector<10x20xf32>
    %c0_32 = arith.constant 0 : index
    %c0_33 = arith.constant 0 : index
    %87 = vector.load %arg6[%c0_32, %c0_33] : memref<10x20xf32, #tpu.memory_space<vmem>>, vector<10x20xf32>
    tpu.vector_store %arg6[%c0_32, %c0_33], %86 {strides = array<i32>} : memref<10x20xf32, #tpu.memory_space<vmem>>, vector<10x20xf32>,
    return
  }
}

</mosaic_0001>

<bundles_post_ra>
// kernel: _lambda_.1
= control target key start
LH: loop header
LB: loop body
LE: loop exit
PB: predicated region body
PF: predicated region fallthrough
CT: control target
= control target key end

     0   :  { %12 = vsyncpa [#allocation3], 0  ;;  %s1967_s21 = smov [#allocation2]   ;;  %s2391_s0 = inlined_call_operand.vmem [shape: f32[30,768], index: 0, kind: input, shape index: {}]   ;;  %s2392_s1 = inlined_call_operand.hbm [shape: bf16[768,256], index: 1, kind: input, shape index: {}]   ;;  %s2393_s2 = inlined_call_operand.vmem [shape: f32[1,256], index: 2, kind: input, shape index: {}]   ;;  %s2394_s3 = inlined_call_operand.vmem [shape: f32[256,5], index: 3, kind: input, shape index: {}]   ;;  %s2395_s4 = inlined_call_operand.vmem [shape: f32[1,5], index: 4, kind: input, shape index: {}]   ;;  %s2396_s5 = inlined_call_operand.vmem [shape: f32[30,5], index: 5, kind: output, shape index: {0}]   ;;  %s2397_s6 = inlined_call_operand.vmem [shape: f32[10,20], index: 6, kind: output, shape index: {1}]  }
   0x1   :  { %s20_s22 = sshll.u32 %s1967_s21, 4  ;;  %s1943_s25 = scalar_lea.hbm %s2392_s1, 12288  ;;  %s21_s22 = int_to_ptr.vmem [resolvable:$true] %s20_s22 }
   0x2   :  { %p1944_p0 = scmp.ne.s32.totalorder %s2392_s1, %s1943_s25  ;;  %p1947_p1 = scmp.lt.u32.totalorder %s1943_s25, %s2392_s1 }
   0x4   :  { %p1949_p2 = pnand %p1947_p1, %p1944_p0 }
   0x6   :  { %1952 = shalt.err (!%p1949_p2)
}
   0x7   :  { %s1953_s30 = scalar_lea.vmem %s21_s22, 12288  ;;  %p1958_p4 = scmp.lt.s32.totalorder %s21_s22, %s21_s22 }
   0x8   :  { %p1954_p3 = scmp.ne.s32.totalorder %s21_s22, %s1953_s30  ;;  %p1959_p5 = scmp.lt.s32.totalorder %s1953_s30, %s1953_s30 }
   0xa   :  { %p1960_p6 = por %p1959_p5, %p1958_p4 }
   0xc   :  { %p1961_p7 = pnand %p1960_p6, %p1954_p3 }
   0xe   :  { %1964 = shalt.err (!%p1961_p7)
}
   0xf   :  { %s1968_s7 = smov 128   ;;  %s1969_s8 = smov 8  }
  0x10   :  { %26 = dma.hbm_to_vmem [thread:$0]  %s2392_s1, 12288, %s21_s22, [#allocation3], %s1968_s7, %s1968_s7, %s1969_s8  }
  0x11   :  { %1965 = dma.done.wait [#allocation3], 12288  }
  0x12   :  { %1966 = vsyncadd [#allocation3], 4294955008  ;;  %v1769_v0 = vld [vmem:[#allocation2 + $0x104] ss:$8 sps:$4 sm:$0xff]   ;;  %v1771_v1 = vld [vmem:[#allocation2 + $0x100] ss:$8 sps:$4 sm:$0xff]  }
  0x13   :  { %713 = vmatprep.subr.bf16.mxu0 %v1769_v0  ;;  %v1772_v2 = vld [vmem:[#allocation2 + $0x114] ss:$8 sps:$4 sm:$0xff]   ;;  %v1774_v3 = vld [vmem:[#allocation2 + $0x110] ss:$8 sps:$4 sm:$0xff]   ;;  %v1775_v4 = vld [vmem:[#allocation2 + $0x124] ss:$8 sps:$4 sm:$0xff]  }
  0x14   :  { %714 = vmatpush1.bf16.msra.mxu0 %v1771_v1  ;;  %v1777_v5 = vld [vmem:[#allocation2 + $0x120] ss:$8 sps:$4 sm:$0xff]   ;;  %v1778_v6 = vld [vmem:[#allocation2 + $0x134] ss:$8 sps:$4 sm:$0xff]   ;;  %v1780_v7 = vld [vmem:[#allocation2 + $0x130] ss:$8 sps:$4 sm:$0xff]  }
  0x15   :  { %715 = vmatprep.subr.bf16.mxu0 %v1772_v2  ;;  %v1781_v8 = vld [vmem:[#allocation2 + $0x144] ss:$8 sps:$4 sm:$0xff]   ;;  %v1783_v9 = vld [vmem:[#allocation2 + $0x140] ss:$8 sps:$4 sm:$0xff]   ;;  %v1784_v10 = vld [vmem:[#allocation2 + $0x154] ss:$8 sps:$4 sm:$0xff]  }
  0x16   :  { %v1786_v11 = vld [vmem:[#allocation2 + $0x150] ss:$8 sps:$4 sm:$0xff]   ;;  %v1787_v12 = vld [vmem:[#allocation2 + $0x164] ss:$8 sps:$4 sm:$0xff]   ;;  %v1816_v14 = vld [vmem:[#allocation2] ss:$8 sps:$4 sm:$0xff]  }
  0x17   :  { %v1814_v13 = vld [vmem:[#allocation2 + $0x4] ss:$8 sps:$4 sm:$0xff]   ;;  %v1789_v15 = vld [vmem:[#allocation2 + $0x160] ss:$8 sps:$4 sm:$0xff]   ;;  %v1790_v16 = vld [vmem:[#allocation2 + $0x174] ss:$8 sps:$4 sm:$0xff]  }
  0x18   :  { %716 = vmatpush1.bf16.msra.mxu0 %v1774_v3  ;;  %660 = vmatprep.subr.bf16.mxu1 %v1814_v13  ;;  %v1820_v17 = vld [vmem:[#allocation2 + $0x14] ss:$8 sps:$4 sm:$0xff]   ;;  %v1822_v18 = vld [vmem:[#allocation2 + $0x10] ss:$8 sps:$4 sm:$0xff]   ;;  %v2026_v20 = vld [vmem:[%s2391_s0 + $0x48] sm:$0xff]  ;;  %vm1008_vm0 = vcmask 1045504  }
  0x19   :  { %717 = vmatprep.subr.bf16.mxu0 %v1775_v4  ;;  %661 = vmatpush1.bf16.msra.mxu1 %v1816_v14  ;;  %v2021_v19 = vld [vmem:[%s2391_s0 + $0x18] sm:$0xff]  ;;  %v1826_v23 = vld [vmem:[#allocation2 + $0x24] ss:$8 sps:$4 sm:$0xff]   ;;  %v1828_v24 = vld [vmem:[#allocation2 + $0x20] ss:$8 sps:$4 sm:$0xff]   ;;  %vm951_vm1 = vcmask 39936  }
  0x1a   :  { %662 = vmatprep.subr.bf16.mxu1 %v1820_v17  ;;  %v63_v21 = vpack.c.bf16 %v2026_v20, %v2021_v19  ;;  %v1792_v22 = vld [vmem:[#allocation2 + $0x170] ss:$8 sps:$4 sm:$0xff]   ;;  %v1793_v25 = vld [vmem:[#allocation2 + $0x184] ss:$8 sps:$4 sm:$0xff]   ;;  %v1795_v26 = vld [vmem:[#allocation2 + $0x180] ss:$8 sps:$4 sm:$0xff]  }
  0x1b   :  { %v1832_v27 = vld [vmem:[#allocation2 + $0x34] ss:$8 sps:$4 sm:$0xff]   ;;  %v1834_v29 = vld [vmem:[#allocation2 + $0x30] ss:$8 sps:$4 sm:$0xff]   ;;  %v1838_v30 = vld [vmem:[#allocation2 + $0x44] ss:$8 sps:$4 sm:$0xff]  }
  0x1c   :  { %718 = vmatpush1.bf16.msra.mxu0 %v1777_v5  ;;  %745 = vmatprep.mubr.bf16.mxu0 %v63_v21  ;;  %v1796_v28 = vld [vmem:[#allocation2 + $0x194] ss:$8 sps:$4 sm:$0xff]   ;;  %v1798_v31 = vld [vmem:[#allocation2 + $0x190] ss:$8 sps:$4 sm:$0xff]   ;;  %v1799_v32 = vld [vmem:[#allocation2 + $0x1a4] ss:$8 sps:$4 sm:$0xff]  }
  0x1d   :  { %719 = vmatprep.subr.bf16.mxu0 %v1778_v6  ;;  %663 = vmatpush1.bf16.msra.mxu1 %v1822_v18  ;;  %v1840_v33 = vld [vmem:[#allocation2 + $0x40] ss:$8 sps:$4 sm:$0xff]   ;;  %v1844_v34 = vld [vmem:[#allocation2 + $0x54] ss:$8 sps:$4 sm:$0xff]   ;;  %v1846_v37 = vld [vmem:[#allocation2 + $0x50] ss:$8 sps:$4 sm:$0xff]  }
  0x1e   :  { %664 = vmatprep.subr.bf16.mxu1 %v1826_v23  ;;  %v1801_v35 = vld [vmem:[#allocation2 + $0x1a0] ss:$8 sps:$4 sm:$0xff]   ;;  %v1802_v36 = vld [vmem:[#allocation2 + $0x1b4] ss:$8 sps:$4 sm:$0xff]   ;;  %v1850_v38 = vld [vmem:[#allocation2 + $0x64] ss:$8 sps:$4 sm:$0xff]  }
  0x1f   :  { %v1804_v39 = vld [vmem:[#allocation2 + $0x1b0] ss:$8 sps:$4 sm:$0xff]   ;;  %v1805_v40 = vld [vmem:[#allocation2 + $0x1c4] ss:$8 sps:$4 sm:$0xff]   ;;  %v1852_v41 = vld [vmem:[#allocation2 + $0x60] ss:$8 sps:$4 sm:$0xff]  }
  0x20   :  { %720 = vmatpush1.bf16.msra.mxu0 %v1780_v7  ;;  %v1856_v42 = vld [vmem:[#allocation2 + $0x74] ss:$8 sps:$4 sm:$0xff]   ;;  %v1807_v43 = vld [vmem:[#allocation2 + $0x1c0] ss:$8 sps:$4 sm:$0xff]   ;;  %v1858_v45 = vld [vmem:[#allocation2 + $0x70] ss:$8 sps:$4 sm:$0xff]  }
  0x21   :  { %721 = vmatprep.subr.bf16.mxu0 %v1781_v8  ;;  %665 = vmatpush1.bf16.msra.mxu1 %v1828_v24  ;;  %v1808_v44 = vld [vmem:[#allocation2 + $0x1d4] ss:$8 sps:$4 sm:$0xff]   ;;  %v1862_v46 = vld [vmem:[#allocation2 + $0x84] ss:$8 sps:$4 sm:$0xff]   ;;  %v1810_v47 = vld [vmem:[#allocation2 + $0x1d0] ss:$8 sps:$4 sm:$0xff]  }
  0x22   :  { %666 = vmatprep.subr.bf16.mxu1 %v1832_v27  ;;  %v1811_v48 = vld [vmem:[#allocation2 + $0x1e4] ss:$8 sps:$4 sm:$0xff]   ;;  %v1864_v49 = vld [vmem:[#allocation2 + $0x80] ss:$8 sps:$4 sm:$0xff]   ;;  %v1868_v50 = vld [vmem:[#allocation2 + $0x94] ss:$8 sps:$4 sm:$0xff]  }
  0x23   :  { %v1813_v51 = vld [vmem:[#allocation2 + $0x1e0] ss:$8 sps:$4 sm:$0xff]   ;;  %v1817_v52 = vld [vmem:[#allocation2 + $0x1f4] ss:$8 sps:$4 sm:$0xff]   ;;  %v1870_v53 = vld [vmem:[#allocation2 + $0x90] ss:$8 sps:$4 sm:$0xff]  }
  0x24   :  { %722 = vmatpush1.bf16.msra.mxu0 %v1783_v9  ;;  %v1874_v54 = vld [vmem:[#allocation2 + $0xa4] ss:$8 sps:$4 sm:$0xff]   ;;  %v1819_v55 = vld [vmem:[#allocation2 + $0x1f0] ss:$8 sps:$4 sm:$0xff]   ;;  %v1876_v59 = vld [vmem:[#allocation2 + $0xa0] ss:$8 sps:$4 sm:$0xff]  }
  0x25   :  { %723 = vmatprep.subr.bf16.mxu0 %v1784_v10  ;;  %667 = vmatpush1.bf16.msra.mxu1 %v1834_v29  ;;  %v1825_v56 = vld [vmem:[#allocation2 + $0x204] ss:$8 sps:$4 sm:$0xff]   ;;  %v2033_v57 = vld [vmem:[%s2391_s0 + $0x10] sm:$0xff]  ;;  %v2045_v62 = vld [vmem:[%s2391_s0 + $0x78] sm:$0xff]  ;;  %vm1334_vm2 = vcmask 39938   ;;  %vm955_vm3 = vcmask 37888  }
  0x26   :  { %668 = vmatprep.subr.bf16.mxu1 %v1838_v30  ;;  %v2038_v58 = vld [vmem:[%s2391_s0 + $0x40] sm:$0xff]  ;;  %v1880_v60 = vld [vmem:[#allocation2 + $0xb4] ss:$8 sps:$4 sm:$0xff]   ;;  %v2050_v63 = vld [vmem:[%s2391_s0 + $0xa8] sm:$0x3f]  ;;  %vm976_vm4 = vcmask 1041408  }
  0x27   :  { %v62_v61 = vpack.c.bf16 %v2038_v58, %v2033_v57  ;;  %v1823_v0 = vld [vmem:[#allocation2 + $0x200] ss:$8 sps:$4 sm:$0xff]   ;;  %v1882_v1 = vld [vmem:[#allocation2 + $0xb0] ss:$8 sps:$4 sm:$0xff]   ;;  %v1831_v2 = vld [vmem:[#allocation2 + $0x214] ss:$8 sps:$4 sm:$0xff]   ;;  %v69_v4 = vpack.c.bf16 %v2050_v63, %v2045_v62 }
  0x28   :  { %724 = vmatpush1.bf16.msra.mxu0 %v1786_v11  ;;  %v1886_v3 = vld [vmem:[#allocation2 + $0xc4] ss:$8 sps:$4 sm:$0xff]   ;;  %v2062_v6 = vld [vmem:[%s2391_s0 + $0x38] sm:$0xff]  ;;  %v1888_v8 = vld [vmem:[#allocation2 + $0xc0] ss:$8 sps:$4 sm:$0xff]   ;;  %vm1286_vm11 = vcmask 162816  }
  0x29   :  { %725 = vmatprep.subr.bf16.mxu0 %v1787_v12  ;;  %669 = vmatpush1.bf16.msra.mxu1 %v1840_v33  ;;  %v2057_v5 = vld [vmem:[%s2391_s0 + $0x8] sm:$0xff]  ;;  %v1829_v7 = vld [vmem:[#allocation2 + $0x210] ss:$8 sps:$4 sm:$0xff]   ;;  %v2074_v11 = vld [vmem:[%s2391_s0 + $0xa0] sm:$0x3f]  ;;  %vm1288_vm12 = vcmask 156672  }
  0x2a   :  { %670 = vmatprep.subr.bf16.mxu1 %v1844_v34  ;;  %v61_v9 = vpack.c.bf16 %v2062_v6, %v2057_v5  ;;  %v2069_v10 = vld [vmem:[%s2391_s0 + $0x70] sm:$0xff]  ;;  %v1837_v12 = vld [vmem:[#allocation2 + $0x224] ss:$8 sps:$4 sm:$0xff]   ;;  %v1835_v17 = vld [vmem:[#allocation2 + $0x220] ss:$8 sps:$4 sm:$0xff]  }
  0x2b   :  { %v1892_v13 = vld [vmem:[#allocation2 + $0xd4] ss:$8 sps:$4 sm:$0xff]   ;;  %v68_v14 = vpack.c.bf16 %v2074_v11, %v2069_v10  ;;  %v1894_v18 = vld [vmem:[#allocation2 + $0xd0] ss:$8 sps:$4 sm:$0xff]   ;;  %v844_v29 = vld [vmem:[%s2394_s3 + $0x88] sm:$0xff] }
  0x2c   :  { %726 = vmatpush1.bf16.msra.mxu0 %v1789_v15  ;;  %692 = vmatprep.mubr.bf16.mxu1 %v61_v9  ;;  %v2081_v15 = vld [vmem:[%s2391_s0 + $0x28] sm:$0xff]  ;;  %v1843_v21 = vld [vmem:[#allocation2 + $0x234] ss:$8 sps:$4 sm:$0xff]   ;;  %v1841_v24 = vld [vmem:[#allocation2 + $0x230] ss:$8 sps:$4 sm:$0xff]  }
  0x2d   :  { %727 = vmatprep.subr.bf16.mxu0 %v1790_v16  ;;  %671 = vmatpush1.bf16.msra.mxu1 %v1846_v37  ;;  %v2086_v16 = vld [vmem:[%s2391_s0 + $0x58] sm:$0xff]  ;;  %v1847_v30 = vld [vmem:[#allocation2 + $0x240] ss:$8 sps:$4 sm:$0xff]   ;;  %v2104_v33 = vld [vmem:[%s2391_s0 + $0x30] sm:$0xff] }
  0x2e   :  { %672 = vmatprep.subr.bf16.mxu1 %v1850_v38  ;;  %v65_v23 = vpack.c.bf16 %v2086_v16, %v2081_v15  ;;  %v1904_v27 = vld [vmem:[#allocation2 + $0xf4] ss:$8 sps:$4 sm:$0xff]   ;;  %v827_v38 = vld [vmem:[%s2394_s3] sm:$0xff]  ;;  %vm1728_vm13 = vmpackc.low %vm951_vm1, %vm951_vm1 }
  0x2f   :  { %v1855_v34 = vld [vmem:[#allocation2 + $0x254] ss:$8 sps:$4 sm:$0xff]  }
  0x30   :  { %728 = vmatpush1.bf16.msra.mxu0 %v1792_v22  ;;  %v1898_v22 = vld [vmem:[#allocation2 + $0xe4] ss:$8 sps:$4 sm:$0xff]   ;;  %v833_v9 = vld [vmem:[%s2394_s3 + $0x30] sm:$0xff] }
  0x31   :  { %729 = vmatprep.subr.bf16.mxu0 %v1793_v25  ;;  %673 = vmatpush1.bf16.msra.mxu1 %v1852_v41  ;;  %v1900_v25 = vld [vmem:[#allocation2 + $0xe0] ss:$8 sps:$4 sm:$0xff]   ;;  %v845_v41 = vld [vmem:[%s2394_s3 + $0x90] sm:$0xff] }
  0x32   :  { %674 = vmatprep.subr.bf16.mxu1 %v1856_v42  ;;  %v846_v42 = vld [vmem:[%s2394_s3 + $0x98] sm:$0xff] }
  0x34   :  { %730 = vmatpush1.bf16.msra.mxu0 %v1795_v26  ;;  %v1849_v26 = vld [vmem:[#allocation2 + $0x244] ss:$8 sps:$4 sm:$0xff]  }
  0x35   :  { %731 = vmatprep.subr.bf16.mxu0 %v1796_v28  ;;  %675 = vmatpush1.bf16.msra.mxu1 %v1858_v45  ;;  %v843_v28 = vld [vmem:[%s2394_s3 + $0x80] sm:$0xff] }
  0x36   :  { %676 = vmatprep.subr.bf16.mxu1 %v1862_v46  ;;  %v1683_v37 = vpack.c.bf16 %v844_v29, %v843_v28  ;;  %v1861_v45 = vld [vmem:[#allocation2 + $0x264] ss:$8 sps:$4 sm:$0xff]   ;;  %v1883_v28 = vld [vmem:[#allocation2 + $0x2a0] ss:$8 sps:$4 sm:$0xff]   ;;  %v1891_v29 = vld [vmem:[#allocation2 + $0x2b4] ss:$8 sps:$4 sm:$0xff]  }
  0x38   :  { %732 = vmatpush1.bf16.msra.mxu0 %v1798_v31  ;;  %v1906_v31 = vld [vmem:[#allocation2 + $0xf0] ss:$8 sps:$4 sm:$0xff]  }
  0x39   :  { %733 = vmatprep.subr.bf16.mxu0 %v1799_v32  ;;  %677 = vmatpush1.bf16.msra.mxu1 %v1864_v49  ;;  %v2099_v32 = vld [vmem:[%s2391_s0] sm:$0xff]  ;;  %v830_v49 = vld [vmem:[%s2394_s3 + $0x18] sm:$0xff] }
  0x3a   :  { %678 = vmatprep.subr.bf16.mxu1 %v1868_v50  ;;  %v847_v50 = vld [vmem:[%s2394_s3 + $0xa0] sm:$0xff] }
  0x3c   :  { %734 = vmatpush1.bf16.msra.mxu0 %v1801_v35  ;;  %v2109_v35 = vld [vmem:[%s2391_s0 + $0x68] sm:$0xff] }
  0x3d   :  { %735 = vmatprep.subr.bf16.mxu0 %v1802_v36  ;;  %679 = vmatpush1.bf16.msra.mxu1 %v1870_v53  ;;  %v2114_v36 = vld [vmem:[%s2391_s0 + $0x98] sm:$0x3f]  ;;  %v2147_v53 = vld [vmem:[%s2391_s0 + $0x60] sm:$0xff] }
  0x3e   :  { %680 = vmatprep.subr.bf16.mxu1 %v1874_v54  ;;  %v2152_v54 = vld [vmem:[%s2391_s0 + $0x90] sm:$0x3f] }
  0x40   :  { %736 = vmatpush1.bf16.msra.mxu0 %v1804_v39  ;;  %v828_v39 = vld [vmem:[%s2394_s3 + $0x8] sm:$0xff] }
  0x41   :  { %737 = vmatprep.subr.bf16.mxu0 %v1805_v40  ;;  %681 = vmatpush1.bf16.msra.mxu1 %v1876_v59  ;;  %v60_v40 = vpack.c.bf16 %v2104_v33, %v2099_v32  ;;  %v1685_v46 = vpack.c.bf16 %v828_v39, %v827_v38  ;;  %v1901_v38 = vld [vmem:[#allocation2 + $0x2d0] ss:$8 sps:$4 sm:$0xff]   ;;  %v1909_v39 = vld [vmem:[#allocation2 + $0x2e4] ss:$8 sps:$4 sm:$0xff]  }
  0x42   :  { %682 = vmatprep.subr.bf16.mxu1 %v1880_v60  ;;  %v831_v60 = vld [vmem:[%s2394_s3 + $0x20] sm:$0xff] }
  0x44   :  { %738 = vmatpush1.bf16.msra.mxu0 %v1807_v43  ;;  %v1853_v43 = vld [vmem:[#allocation2 + $0x250] ss:$8 sps:$4 sm:$0xff]  }
  0x45   :  { %739 = vmatprep.subr.bf16.mxu0 %v1808_v44  ;;  %683 = vmatpush1.bf16.msra.mxu1 %v1882_v1  ;;  %v67_v44 = vpack.c.bf16 %v2114_v36, %v2109_v35  ;;  %v849_v1 = vld [vmem:[%s2394_s3 + $0xb0] sm:$0xff] }
  0x46   :  { %684 = vmatprep.subr.bf16.mxu1 %v1886_v3  ;;  %v1865_v3 = vld [vmem:[#allocation2 + $0x270] ss:$8 sps:$4 sm:$0xff]  }
  0x48   :  { %740 = vmatpush1.bf16.msra.mxu0 %v1810_v47  ;;  %v1687_v47 = vpack.c.bf16 %v846_v42, %v845_v41  ;;  %v1912_v41 = vld [vmem:[#allocation2 + $0x2f4] ss:$8 sps:$4 sm:$0xff]   ;;  %v1910_v42 = vld [vmem:[#allocation2 + $0x2f0] ss:$8 sps:$4 sm:$0xff]  }
  0x49   :  { %741 = vmatprep.subr.bf16.mxu0 %v1811_v48  ;;  %685 = vmatpush1.bf16.msra.mxu1 %v1888_v8  ;;  %v829_v48 = vld [vmem:[%s2394_s3 + $0x10] sm:$0xff] }
  0x4a   :  { %686 = vmatprep.subr.bf16.mxu1 %v1892_v13  ;;  %v851_v13 = vld [vmem:[%s2394_s3 + $0xc0] sm:$0xff] }
  0x4c   :  { %742 = vmatpush1.bf16.msra.mxu0 %v1813_v51  ;;  %v848_v51 = vld [vmem:[%s2394_s3 + $0xa8] sm:$0xff] }
  0x4d   :  { %743 = vmatprep.subr.bf16.mxu0 %v1817_v52  ;;  %687 = vmatpush1.bf16.msra.mxu1 %v1894_v18  ;;  %v1859_v52 = vld [vmem:[#allocation2 + $0x260] ss:$8 sps:$4 sm:$0xff]   ;;  %v1691_v59 = vpack.c.bf16 %v848_v51, %v847_v50  ;;  %v1879_v18 = vld [vmem:[#allocation2 + $0x294] ss:$8 sps:$4 sm:$0xff]  }
  0x4e   :  { %688 = vmatprep.subr.bf16.mxu1 %v1898_v22  ;;  %v2218_v50 = vld [vmem:[%s2391_s0 + $0xb0] sm:$0x3f] }
  0x50   :  { %744 = vmatpush1.bf16.msra.mxu0 %v1819_v55  ;;  %v1867_v55 = vld [vmem:[#allocation2 + $0x274] ss:$8 sps:$4 sm:$0xff]  }
  0x51   :  { %766 = vmatprep.subr.bf16.mxu0 %v1825_v56  ;;  %689 = vmatpush1.bf16.msra.mxu1 %v1900_v25  ;;  %v1689_v56 = vpack.c.bf16 %v830_v49, %v829_v48  ;;  %v1877_v25 = vld [vmem:[#allocation2 + $0x290] ss:$8 sps:$4 sm:$0xff]   ;;  %v2213_v49 = vld [vmem:[%s2391_s0 + $0x80] sm:$0xff] }
  0x52   :  { %690 = vmatprep.subr.bf16.mxu1 %v1904_v27  ;;  %v70_v51 = vpack.c.bf16 %v2218_v50, %v2213_v49 }
  0x53   :  { %746 = vmatmul.mubr.bf16.vlgmr.msra.gmra.mrb[0].mxu0 %v62_v61  ;;  %v832_v61 = vld [vmem:[%s2394_s3 + $0x28] sm:$0xff] }
  0x54   :  { %767 = vmatpush1.bf16.msra.mxu0 %v1823_v0  ;;  %755 = vmatprep.mubr.bf16.mxu0 %v69_v4  ;;  %v66_v0 = vpack.c.bf16 %v2152_v54, %v2147_v53  ;;  %v1873_v4 = vld [vmem:[#allocation2 + $0x284] ss:$8 sps:$4 sm:$0xff]  }
  0x55   :  { %768 = vmatprep.subr.bf16.mxu0 %v1831_v2  ;;  %691 = vmatpush1.bf16.msra.mxu1 %v1906_v31  ;;  %v850_v2 = vld [vmem:[%s2394_s3 + $0xb8] sm:$0xff]  ;;  %v1897_v31 = vld [vmem:[#allocation2 + $0x2c4] ss:$8 sps:$4 sm:$0xff]  }
  0x56   :  { %1684 = vmatprep.subr.bf16.mxu1 %v1683_v37  ;;  %v1695_v8 = vpack.c.bf16 %v850_v2, %v849_v1  ;;  %v1903_v37 = vld [vmem:[#allocation2 + $0x2d4] ss:$8 sps:$4 sm:$0xff]   ;;  %v856_v1 = vld [vmem:[%s2394_s3 + $0xe8] sm:$0xff] }
  0x58   :  { %769 = vmatpush1.bf16.msra.mxu0 %v1829_v7  ;;  %693 = vmatmul.mubr.bf16.vlgmr.msra.gmra.mrb[0].mxu1 %v60_v40  ;;  %v1693_v7 = vpack.c.bf16 %v832_v61, %v831_v60  ;;  %v1907_v40 = vld [vmem:[#allocation2 + $0x2e0] ss:$8 sps:$4 sm:$0xff]   ;;  %v838_v60 = vld [vmem:[%s2394_s3 + $0x58] sm:$0xff] }
  0x59   :  { %770 = vmatprep.subr.bf16.mxu0 %v1837_v12  ;;  %702 = vmatprep.mubr.bf16.mxu1 %v67_v44  ;;  %v834_v12 = vld [vmem:[%s2394_s3 + $0x38] sm:$0xff]  ;;  %v2194_v44 = vld [vmem:[%s2391_s0 + $0x50] sm:$0xff] }
  0x5a   :  { %1686 = vmatpush3.bf16.msra.mxu1 %v1685_v46  ;;  %v2204_v46 = vld [vmem:[%s2391_s0 + $0xb8] sm:$0x3f] }
  0x5b   :  { %756 = vmatmul.mubr.bf16.gmra.mrb[4].mxu0 %v68_v14  ;;  %1688 = vmatprep.subr.bf16.mxu1 %v1687_v47  ;;  %v852_v14 = vld [vmem:[%s2394_s3 + $0xc8] sm:$0xff] }
  0x5c   :  { %771 = vmatpush1.bf16.msra.mxu0 %v1835_v17  ;;  %798 = vmatprep.mubr.bf16.mxu0 %v65_v23  ;;  %v1871_v17 = vld [vmem:[#allocation2 + $0x280] ss:$8 sps:$4 sm:$0xff]   ;;  %v1699_v22 = vpack.c.bf16 %v852_v14, %v851_v13  ;;  %v841_v13 = vld [vmem:[%s2394_s3 + $0x70] sm:$0xff]  ;;  %v842_v14 = vld [vmem:[%s2394_s3 + $0x78] sm:$0xff] }
  0x5d   :  { %772 = vmatprep.subr.bf16.mxu0 %v1843_v21  ;;  %v1697_v21 = vpack.c.bf16 %v834_v12, %v833_v9  ;;  %v835_v23 = vld [vmem:[%s2394_s3 + $0x40] sm:$0xff]  ;;  %v858_v9 = vld [vmem:[%s2394_s3 + $0xf8] sm:$0xff] }
  0x5e   :  { %1690 = vmatpush3.bf16.msra.mxu1 %v1689_v56 }
  0x5f   :  { %1692 = vmatprep.subr.bf16.mxu1 %v1691_v59  ;;  %v837_v59 = vld [vmem:[%s2394_s3 + $0x50] sm:$0xff] }
  0x60   :  { %773 = vmatpush1.bf16.msra.mxu0 %v1841_v24  ;;  %703 = vmatmul.mubr.bf16.gmra.mrb[4].mxu1 %v66_v0  ;;  %v836_v24 = vld [vmem:[%s2394_s3 + $0x48] sm:$0xff]  ;;  %v1705_v61 = vpack.c.bf16 %v838_v60, %v837_v59  ;;  %v855_v0 = vld [vmem:[%s2394_s3 + $0xe0] sm:$0xff] }
  0x61   :  { %774 = vmatprep.subr.bf16.mxu0 %v1849_v26  ;;  %v1885_v26 = vld [vmem:[#allocation2 + $0x2a4] ss:$8 sps:$4 sm:$0xff]   ;;  %v1701_v27 = vpack.c.bf16 %v836_v24, %v835_v23  ;;  %v1707_v2 = vpack.c.bf16 %v856_v1, %v855_v0 }
  0x62   :  { %1694 = vmatpush3.bf16.msra.mxu1 %v1693_v7 }
  0x63   :  { %1696 = vmatprep.subr.bf16.mxu1 %v1695_v8  ;;  %v857_v8 = vld [vmem:[%s2394_s3 + $0xf0] sm:$0xff] }
  0x64   :  { %775 = vmatpush1.bf16.msra.mxu0 %v1847_v30  ;;  %v1889_v30 = vld [vmem:[#allocation2 + $0x2b0] ss:$8 sps:$4 sm:$0xff]   ;;  %v1711_v12 = vpack.c.bf16 %v858_v9, %v857_v8 }
  0x65   :  { %776 = vmatprep.subr.bf16.mxu0 %v1855_v34  ;;  %v1895_v34 = vld [vmem:[#allocation2 + $0x2c0] ss:$8 sps:$4 sm:$0xff]  }
  0x66   :  { %1698 = vmatpush3.bf16.msra.mxu1 %v1697_v21 }
  0x67   :  { %1700 = vmatprep.subr.bf16.mxu1 %v1699_v22 }
  0x68   :  { %777 = vmatpush1.bf16.msra.mxu0 %v1853_v43  ;;  %v2189_v43 = vld [vmem:[%s2391_s0 + $0x20] sm:$0xff] }
  0x69   :  { %778 = vmatprep.subr.bf16.mxu0 %v1861_v45  ;;  %v2199_v45 = vld [vmem:[%s2391_s0 + $0x88] sm:$0xff]  ;;  %v64_v47 = vpack.c.bf16 %v2194_v44, %v2189_v43 }
  0x6a   :  { %1702 = vmatpush3.bf16.msra.mxu1 %v1701_v27  ;;  %v71_v48 = vpack.c.bf16 %v2204_v46, %v2199_v45 }
  0x6c   :  { %779 = vmatpush1.bf16.msra.mxu0 %v1859_v52  ;;  %v853_v52 = vld [vmem:[%s2394_s3 + $0xd0] sm:$0xff] }
  0x6d   :  { %780 = vmatprep.subr.bf16.mxu0 %v1867_v55  ;;  %v854_v55 = vld [vmem:[%s2394_s3 + $0xd8] sm:$0xff] }
  0x6e   :  { %v1703_v56 = vpack.c.bf16 %v854_v55, %v853_v52 }
  0x70   :  { %781 = vmatpush1.bf16.msra.mxu0 %v1865_v3  ;;  %1704 = vmatprep.subr.bf16.mxu1 %v1703_v56  ;;  %v839_v3 = vld [vmem:[%s2394_s3 + $0x60] sm:$0xff] }
  0x71   :  { %782 = vmatprep.subr.bf16.mxu0 %v1873_v4  ;;  %1706 = vmatpush3.bf16.msra.mxu1 %v1705_v61  ;;  %v840_v4 = vld [vmem:[%s2394_s3 + $0x68] sm:$0xff] }
  0x72   :  { %1708 = vmatprep.subr.bf16.mxu1 %v1707_v2  ;;  %v1709_v7 = vpack.c.bf16 %v840_v4, %v839_v3 }
  0x74   :  { %783 = vmatpush1.bf16.msra.mxu0 %v1871_v17  ;;  %v1713_v17 = vpack.c.bf16 %v842_v14, %v841_v13 }
  0x75   :  { %784 = vmatprep.subr.bf16.mxu0 %v1879_v18  ;;  %1710 = vmatpush3.bf16.msra.mxu1 %v1709_v7 }
  0x76   :  { %1712 = vmatprep.subr.bf16.mxu1 %v1711_v12 }
  0x78   :  { %785 = vmatpush1.bf16.msra.mxu0 %v1877_v25 }
  0x79   :  { %786 = vmatprep.subr.bf16.mxu0 %v1885_v26  ;;  %1714 = vmatpush3.bf16.msra.mxu1 %v1713_v17 }
  0x7c   :  { %787 = vmatpush1.bf16.msra.mxu0 %v1883_v28  ;;  %v170_v28 = vlaneseq }
  0x7d   :  { %788 = vmatprep.subr.bf16.mxu0 %v1891_v29 }
  0x7e   :  { %v2259_v29 = vshrl.u32 %v170_v28, 7 }
  0x80   :  { %789 = vmatpush1.bf16.msra.mxu0 %v1889_v30  ;;  %v172_v30 = vsub.s32 0, %v2259_v29 }
  0x81   :  { %790 = vmatprep.subr.bf16.mxu0 %v1897_v31  ;;  %v168_v31 = vld [vmem:[%s2393_s2] sm:$0x3] }
  0x84   :  { %791 = vmatpush1.bf16.msra.mxu0 %v1895_v34  ;;  %v176_v34 = vsub.s32 1, %v2259_v29 }
  0x85   :  { %792 = vmatprep.subr.bf16.mxu0 %v1903_v37  ;;  %v173_v37 = vrot.slane %v168_v31, %v172_v30 }
  0x88   :  { %793 = vmatpush1.bf16.msra.mxu0 %v1901_v38  ;;  %v177_v38 = vrot.slane %v168_v31, %v176_v34  ;;  %v1013_v31 = vrot.slane %v2109_v35, 2  ;;  %v1029_v34 = vrot.slane %v2114_v36, 2 }
  0x89   :  { %794 = vmatprep.subr.bf16.mxu0 %v1909_v39 }
  0x8a   :  { %v1030_v36 = vsel %vm1008_vm0, %v1013_v31, %v1029_v34 }
  0x8c   :  { %795 = vmatpush1.bf16.msra.mxu0 %v1907_v40 }
  0x8d   :  { %796 = vmatprep.subr.bf16.mxu0 %v1912_v41 }
  0x90   :  { %797 = vmatpush1.bf16.msra.mxu0 %v1910_v42 }
  0x93   :  { %799 = vmatmul.mubr.bf16.vlgmr.msra.gmra.mrb[0].mxu0 %v64_v47 }
  0x94   :  { %808 = vmatprep.mubr.bf16.mxu0 %v71_v48 }
  0x9b   :  { %809 = vmatmul.mubr.bf16.gmra.mrb[4].mxu0 %v70_v51 }
 0x12b   :  { %v694_v18 = vpop.f32.mrb[0].mxu1 }
 0x12c   :  { %v696_v21 = vpop.f32.mrb[1].mxu1  ;;  %v695_v39 = vadd.f32 %v694_v18, %v173_v37 }
 0x12d   :  { %v698_v22 = vpop.f32.mrb[2].mxu1  ;;  %v697_v40 = vadd.f32 %v696_v21, %v177_v38 }
 0x12e   :  { %v700_v23 = vpop.f32.mrb[3].mxu1  ;;  %v699_v42 = vadd.f32 %v698_v22, %v173_v37 }
 0x12f   :  { %v701_v51 = vadd.f32 %v700_v23, %v177_v38 }
 0x133   :  { %v704_v24 = vpop.f32.mrb[4].mxu1 }
 0x134   :  { %v706_v25 = vpop.f32.mrb[5].mxu1  ;;  %v705_v1 = vadd.f32 %v704_v24, %v173_v37 }
 0x135   :  { %v708_v26 = vpop.f32.mrb[6].mxu1  ;;  %v707_v3 = vadd.f32 %v706_v25, %v177_v38 }
 0x136   :  { %v710_v27 = vpop.f32.mrb[7].mxu1  ;;  %v709_v8 = vadd.f32 %v708_v26, %v173_v37  ;;  %v1012_v26 = vrot.slane %v2062_v6, 2  ;;  %v1010_v37 = vrot.slane %v2147_v53, 2 }
 0x137   :  { %v711_v13 = vadd.f32 %v710_v27, %v177_v38  ;;  %v1009_v27 = vrot.slane %v2104_v33, 2  ;;  %v1027_v38 = vrot.slane %v2152_v54, 2 }
 0x138   :  { %v1014_v35 = vsel %vm1008_vm0, %v1012_v26, %v1013_v31  ;;  %v1022_v26 = vrot.slane %v2213_v49, 2  ;;  %v1024_v31 = vrot.slane %v2086_v16, 2  ;;  %v958_v49 = vmul.f32 %v2057_v5, %v2057_v5 }
 0x139   :  { %v1011_v53 = vsel %vm1008_vm0, %v1009_v27, %v1010_v37  ;;  %v1028_v54 = vsel %vm1008_vm0, %v1010_v37, %v1027_v38  ;;  %v1035_v27 = vrot.slane %v2218_v50, 2  ;;  %v957_v50 = vmul.f32 %v2099_v32, %v2099_v32 }
 0x166   :  { %v800_v41 = vpop.f32.mrb[0].mxu0 }
 0x167   :  { %v1734_v47 = vadd.f32 %v800_v41, %v695_v39  ;;  %v802_v48 = vpop.f32.mrb[1].mxu0  ;;  %v1018_v39 = vrot.slane %v2026_v20, 2  ;;  %v1033_v41 = vrot.slane %v2050_v63, 2 }
 0x168   :  { %v1736_v52 = vadd.f32 %v802_v48, %v697_v40  ;;  %v804_v55 = vpop.f32.mrb[2].mxu0  ;;  %v1019_v40 = vrot.slane %v2045_v62, 2  ;;  %v1031_v48 = vrot.slane %v2074_v11, 2 }
 0x169   :  { %v1738_v56 = vadd.f32 %v804_v55, %v699_v42  ;;  %v806_v59 = vpop.f32.mrb[3].mxu0  ;;  %v819_v0 = vmax.f32 %v1734_v47, 0.0  ;;  %v1015_v42 = vrot.slane %v2038_v58, 2  ;;  %v1016_v47 = vrot.slane %v2069_v10, 2 }
 0x16a   :  { %v820_v60 = vmax.f32 %v1736_v52, 0.0  ;;  %v1740_v61 = vadd.f32 %v806_v59, %v701_v51  ;;  %v1715_v51 = vpack.c.bf16 %v1030_v36, %v1014_v35  ;;  %v1717_v52 = vpack.c.bf16 %v1028_v54, %v1011_v53 }
 0x16b   :  { %v821_v7 = vmax.f32 %v1738_v56, 0.0  ;;  %v1020_v62 = vsel %vm1008_vm0, %v1018_v39, %v1019_v40  ;;  %v1034_v63 = vsel %vm1008_vm0, %v1019_v40, %v1033_v41  ;;  %v1017_v10 = vsel %vm1008_vm0, %v1015_v42, %v1016_v47 }
 0x16c   :  { %v822_v2 = vmax.f32 %v1740_v61, 0.0  ;;  %930 = vmatprep.mubr.f32.mxu1 %v820_v60  ;;  %v1719_v55 = vpack.c.bf16 %v1034_v63, %v1020_v62  ;;  %v1032_v11 = vsel %vm1008_vm0, %v1016_v47, %v1031_v48  ;;  %1716 = vmatprep.subr.bf16.mxu1 %v1715_v51  ;;  %v1617_v60 = vld [vmem:[%s2395_s4] ss:$0 sm:$0xff]  ;;  %v964_v47 = vmul.f32 %v2062_v6, %v2062_v6 }
 0x16d   :  { %931 = vmatmul.mubr.f32.vlgmr.msra.gmra.mrb[8].mxu1 %v819_v0  ;;  %v1721_v56 = vpack.c.bf16 %v1032_v11, %v1017_v10  ;;  %v959_v53 = vmul.f32 %v2033_v57, %v2033_v57  ;;  %v969_v51 = vadd.f32 %v958_v49, %v957_v50 }
 0x16e   :  { %v810_v4 = vpop.f32.mrb[4].mxu0  ;;  %935 = vmatprep.mubr.f32.mxu1 %v822_v2  ;;  %1718 = vmatpush1.bf16.xpose.msra.mxu1 %v1717_v52 }
 0x16f   :  { %v1742_v9 = vadd.f32 %v810_v4, %v705_v1  ;;  %v812_v12 = vpop.f32.mrb[5].mxu0  ;;  %1061 = vmatprep.subr.mxu1 %v1029_v34  ;;  %v1021_v34 = vrot.slane %v2194_v44, 2  ;;  %v970_v10 = vadd.f32 %v969_v51, %v959_v53 }
 0x170   :  { %v1744_v14 = vadd.f32 %v812_v12, %v707_v3  ;;  %v814_v17 = vpop.f32.mrb[6].mxu0 }
 0x171   :  { %v1746_v18 = vadd.f32 %v814_v17, %v709_v8  ;;  %v816_v21 = vpop.f32.mrb[7].mxu0  ;;  %936 = vmatmul.mubr.f32.gmra.mrb[10].mxu1 %v821_v7  ;;  %v823_v30 = vmax.f32 %v1742_v9, 0.0  ;;  %v1023_v40 = vsel %vm1008_vm0, %v1021_v34, %v1022_v26 }
 0x172   :  { %v824_v22 = vmax.f32 %v1744_v14, 0.0  ;;  %v1748_v23 = vadd.f32 %v816_v21, %v711_v13 }
 0x173   :  { %v825_v25 = vmax.f32 %v1746_v18, 0.0 }
 0x174   :  { %v826_v24 = vmax.f32 %v1748_v23, 0.0  ;;  %940 = vmatprep.mubr.f32.mxu1 %v824_v22 }
 0x175   :  { %941 = vmatmul.mubr.f32.gmra.mrb[12].mxu1 %v823_v30 }
 0x176   :  { %945 = vmatprep.mubr.f32.mxu1 %v826_v24  ;;  %1062 = vmatpush1.xpose.msra.mxu1 %v1027_v38  ;;  %v1025_v24 = vrot.slane %v2199_v45, 2 }
 0x177   :  { %1720 = vmatprep.subr.bf16.mxu1 %v1719_v55 }
 0x178   :  { %v1026_v37 = vsel %vm1008_vm0, %v1024_v31, %v1025_v24 }
 0x179   :  { %946 = vmatmul.mubr.f32.gmra.mrb[14].mxu1 %v825_v25  ;;  %v1037_v25 = vrot.slane %v2204_v46, 2 }
 0x17a   :  { %1121 = vmatprep.mubr.f32.mxu1 %v2057_v5  ;;  %v978_v5 = vsel %vm976_vm4, %v964_v47, 0.0 }
 0x17b   :  { %v1038_v38 = vsel %vm1008_vm0, %v1025_v24, %v1037_v25 }
 0x17c   :  { %v1723_v39 = vpack.c.bf16 %v1038_v38, %v1026_v37 }
 0x17d   :  { %1122 = vmatmul.mubr.f32.vlgmr.msra.gmra.mrb[16].mxu1 %v2099_v32  ;;  %v965_v32 = vmul.f32 %v2038_v58, %v2038_v58 }
 0x17e   :  { %1722 = vmatpush1.bf16.xpose.msra.mxu1 %v1721_v56  ;;  %1126 = vmatprep.mubr.f32.mxu1 %v2062_v6 }
 0x17f   :  { %1136 = vmatprep.subr.mxu1 %v1033_v41  ;;  %v1036_v41 = vsel %vm1008_vm0, %v1022_v26, %v1035_v27  ;;  %v980_v11 = vsel %vm976_vm4, %v965_v32, 0.0 }
 0x180   :  { %v1725_v45 = vpack.c.bf16 %v1036_v41, %v1023_v40 }
 0x181   :  { %1127 = vmatmul.mubr.f32.gmra.mrb[18].mxu1 %v2104_v33 }
 0x182   :  { %1196 = vmatprep.mubr.f32.mxu1 %v2021_v19 }
 0x186   :  { %1137 = vmatpush1.xpose.msra.mxu1 %v1031_v48  ;;  %v963_v48 = vmul.f32 %v2104_v33, %v2104_v33  ;;  %v960_v33 = vmul.f32 %v2021_v19, %v2021_v19  ;;  %v967_v19 = vmul.f32 %v2194_v44, %v2194_v44 }
 0x187   :  { %1724 = vmatprep.subr.bf16.mxu1 %v1723_v39 }
 0x188   :  { %v977_v52 = vsel %vm976_vm4, %v963_v48, 0.0 }
 0x189   :  { %1197 = vmatmul.mubr.f32.vlgmr.msra.gmra.mrb[16].mxu1 %v2033_v57  ;;  %v979_v55 = vadd.f32 %v978_v5, %v977_v52  ;;  %v966_v57 = vmul.f32 %v2026_v20, %v2026_v20 }
 0x18a   :  { %1201 = vmatprep.mubr.f32.mxu1 %v2026_v20  ;;  %1726 = vmatpush1.bf16.xpose.msra.mxu1 %v1725_v45  ;;  %v962_v20 = vmul.f32 %v2081_v15, %v2081_v15 }
 0x18b   :  { %1211 = vmatprep.subr.mxu1 %v1037_v25 }
 0x18d   :  { %1202 = vmatmul.mubr.f32.gmra.mrb[18].mxu1 %v2038_v58  ;;  %v961_v58 = vmul.f32 %v2189_v43, %v2189_v43 }
 0x18e   :  { %1271 = vmatprep.mubr.f32.mxu1 %v2081_v15  ;;  %v1372_v15 = vand.u32 127, %v170_v28 }
 0x192   :  { %1212 = vmatpush1.xpose.msra.mxu1 %v1035_v27 }
 0x195   :  { %1272 = vmatmul.mubr.f32.vlgmr.msra.gmra.mrb[16].mxu1 %v2189_v43  ;;  %v984_v43 = vsel %vm976_vm4, %v967_v19, 0.0 }
 0x196   :  { %1276 = vmatprep.mubr.f32.mxu1 %v2086_v16 }
 0x199   :  { %1277 = vmatmul.mubr.f32.gmra.mrb[18].mxu1 %v2194_v44 }
 0x240   :  { %v1657_v59 = vpop.f32.mrb[8].mxu1 }
 0x241   :  { %v1658_v61 = vpop.f32.mrb[9].mxu1 }
 0x242   :  { %v1659_v0 = vadd.f32 %v1658_v61, %v1657_v59  ;;  %v981_v59 = vadd.f32 %v980_v11, %v979_v55  ;;  %v982_v61 = vsel %vm976_vm4, %v966_v57, 0.0 }
 0x244   :  { %v933_v1 = vadd.f32 %v1659_v0, %v1617_v60  ;;  %v1660_v2 = vpop.f32.mrb[10].mxu1 }
 0x245   :  { %v1661_v3 = vpop.f32.mrb[11].mxu1 }
 0x246   :  { %952 = vst.msk [vmem:[%s2396_s5] sm:$0xff] %vm951_vm1, %v933_v1  ;;  %v1662_v4 = vadd.f32 %v1661_v3, %v1660_v2  ;;  %v983_v2 = vadd.f32 %v982_v61, %v981_v59 }
 0x248   :  { %v938_v7 = vadd.f32 %v1662_v4, %v1617_v60  ;;  %v1663_v8 = vpop.f32.mrb[12].mxu1  ;;  %v968_v4 = vmul.f32 %v2086_v16, %v2086_v16  ;;  %v985_v44 = vadd.f32 %v984_v43, %v983_v2  ;;  %v1376_v16 = vadd.s32 1, %v1372_v15 }
 0x249   :  { %v1664_v9 = vpop.f32.mrb[13].mxu1 }
 0x24a   :  { %953 = vst.msk [vmem:[%s2396_s5 + $0x8] sm:$0xff] %vm951_vm1, %v938_v7  ;;  %v1665_v12 = vadd.f32 %v1664_v9, %v1663_v8  ;;  %v1335_v13 = vsel %vm1334_vm2, %v938_v7, -inf }
 0x24b   :  { %1336 = vmax.xlane.f32.xlu0 %v1335_v13 }
 0x24c   :  { %v943_v14 = vadd.f32 %v1665_v12, %v1617_v60  ;;  %v1666_v17 = vpop.f32.mrb[14].mxu1  ;;  %v986_v12 = vsel %vm976_vm4, %v968_v4, 0.0 }
 0x24d   :  { %v1667_v18 = vpop.f32.mrb[15].mxu1 }
 0x24e   :  { %954 = vst.msk [vmem:[%s2396_s5 + $0x10] sm:$0xff] %vm951_vm1, %v943_v14  ;;  %v1668_v21 = vadd.f32 %v1667_v18, %v1666_v17  ;;  %v1338_v22 = vsel %vm951_vm1, %v943_v14, -inf  ;;  %v987_v17 = vadd.f32 %v986_v12, %v985_v44  ;;  %v1373_v18 = vmul.u32 2, %v1372_v15 }
 0x24f   :  { %1339 = vmax.xlane.f32.xlu0 %v1338_v22  ;;  %v1370_v22 = vadd.s32 8, %v2259_v29 }
 0x250   :  { %v948_v23 = vadd.f32 %v1668_v21, %v1617_v60  ;;  %v971_v60 = vadd.f32 %v970_v10, %v960_v33  ;;  %v1377_v21 = vmul.u32 2, %v1376_v16  ;;  %vm1374_vm5 = vcmp.ge.s32.totalorder %v2259_v29, %v1373_v18 }
 0x251   :  { %vm1375_vm7 = vcmp.ge.s32.totalorder %v1370_v22, %v1373_v18 }
 0x252   :  { %v1341_v30 = vsel %vm955_vm3, %v948_v23, -inf  ;;  %956 = vst.msk [vmem:[%s2396_s5 + $0x18] sm:$0x3f] %vm955_vm3, %v948_v23  ;;  %v972_v3 = vadd.f32 %v971_v60, %v961_v58  ;;  %vm1378_vm6 = vcmp.lt.s32.totalorder %v2259_v29, %v1377_v21  ;;  %vm1379_vm8 = vcmp.lt.s32.totalorder %v1370_v22, %v1377_v21 }
 0x253   :  { %1342 = vmax.xlane.f32.xlu1 %v1341_v30  ;;  %vm1380_vm9 = vmand %vm1374_vm5, %vm1378_vm6 }
 0x254   :  { %v973_v9 = vadd.f32 %v972_v3, %v962_v20  ;;  %vm1381_vm10 = vmand %vm1375_vm7, %vm1379_vm8 }
 0x268   :  { %v1273_v25 = vpop.f32.mrb[16].mxu1 }
 0x269   :  { %v1275_v28 = vpop.f32.mrb[17].mxu1  ;;  %v1282_v37 = vmul.f32 2.0, %v1273_v25 }
 0x26c   :  { %v1278_v26 = vpop.f32.mrb[18].mxu1 }
 0x26d   :  { %v1280_v27 = vpop.f32.mrb[19].mxu1  ;;  %v1283_v39 = vmul.f32 2.0, %v1278_v26 }
 0x2d8   :  { %v1337_v46 = vpop.xlane.xlu0 %1336 }
 0x2d9   :  { %v1344_v42 = vsub.f32 %v938_v7, %v1337_v46 }
 0x2db   :  { %v1347_v35 = vmul.f32 1.442695, %v1344_v42 }
 0x2dc   :  { %v1340_v36 = vpop.xlane.xlu0 %1339 }
 0x2dd   :  { %1913 = vpow2.f32 %v1347_v35  ;;  %v1345_v54 = vsub.f32 %v943_v14, %v1340_v36 }
 0x2df   :  { %v1349_v6 = vmul.f32 1.442695, %v1345_v54 }
 0x2e0   :  { %v1343_v62 = vpop.xlane.xlu1 %1342 }
 0x2e1   :  { %1915 = vpow2.f32 %v1349_v6  ;;  %v1346_v63 = vsub.f32 %v948_v23, %v1343_v62  ;;  %v1970_v23 = vmov 0.0  }
 0x2e2   :  { %v1618_v30 = vsel %vm1380_vm9, 1.0, %v1970_v23  ;;  %v1619_v24 = vsel %vm1381_vm10, 1.0, %v1970_v23 }
 0x2e3   :  { %v1351_v56 = vmul.f32 1.442695, %v1346_v63  ;;  %1680 = vmatprep.mubr.msk.f32.mxu0 %vm951_vm1, %v1618_v30 }
 0x2e5   :  { %1917 = vpow2.f32 %v1351_v56 }
 0x2e7   :  { %v1914_v0 = vpop.eup %1913 }
 0x2e8   :  { %v1353_v1 = vsel %vm1334_vm2, %v1914_v0, 0.0 }
 0x2e9   :  { %1354 = vadd.xlane.f32.xlu1 %v1353_v1 }
 0x2eb   :  { %v1916_v7 = vpop.eup %1915 }
 0x2ec   :  { %v1356_v8 = vsel %vm951_vm1, %v1916_v7, 0.0 }
 0x2ed   :  { %1357 = vadd.xlane.f32.xlu0 %v1356_v8 }
 0x2ef   :  { %v1918_v13 = vpop.eup %1917 }
 0x2f0   :  { %v1359_v14 = vsel %vm955_vm3, %v1918_v13, 0.0 }
 0x2f1   :  { %1360 = vadd.xlane.f32.xlu1 %v1359_v14  ;;  %974 = vadd.xlane.f32.xlu0 %v973_v9 }
 0x2f5   :  { %988 = vadd.xlane.f32.xlu1 %v987_v17 }
 0x376   :  { %v1355_v31 = vpop.xlane.xlu1 %1354 }
 0x377   :  { %1919 = vrcp.f32 %v1355_v31 }
 0x37a   :  { %v1358_v34 = vpop.xlane.xlu0 %1357 }
 0x37b   :  { %1921 = vrcp.f32 %v1358_v34 }
 0x37e   :  { %v1361_v38 = vpop.xlane.xlu1 %1360  ;;  %v975_v29 = vpop.xlane.xlu0 %974 }
 0x37f   :  { %1923 = vrcp.f32 %v1361_v38  ;;  %v1284_v40 = vsub.f32 %v1282_v37, %v975_v29 }
 0x381   :  { %v1287_v46 = vsel %vm1286_vm11, %v1284_v40, -inf  ;;  %v1920_v49 = vpop.eup %1919 }
 0x382   :  { %v989_v41 = vpop.xlane.xlu1 %988  ;;  %v1363_v35 = vmul.f32 %v1920_v49, %v1914_v0 }
 0x383   :  { %v1285_v45 = vsub.f32 %v1283_v39, %v989_v41 }
 0x384   :  { %v1389_v32 = vrot.slane %v1363_v35, 2 }
 0x385   :  { %v1922_v50 = vpop.eup %1921  ;;  %v1289_v42 = vsel %vm1288_vm12, %v1285_v45, -inf }
 0x386   :  { %v1365_v47 = vmul.f32 %v1922_v50, %v1916_v7  ;;  %v1290_v48 = vmax.f32 %v1287_v46, %v1289_v42 }
 0x388   :  { %v1291_v36 = vrot.slane %v1290_v48, 4  ;;  %v1390_v54 = vrot.slane %v1365_v47, 2 }
 0x389   :  { %v1924_v53 = vpop.eup %1923 }
 0x38a   :  { %v1367_v51 = vmul.f32 %v1924_v53, %v1918_v13  ;;  %v1292_v5 = vmax.f32 %v1290_v48, %v1291_v36  ;;  %v1391_v33 = vsel %vm1008_vm0, %v1389_v32, %v1390_v54 }
 0x38c   :  { %v1392_v52 = vrot.slane %v1367_v51, 2  ;;  %v1293_v6 = vrot.slane %v1292_v5, 2 }
 0x38e   :  { %v1393_v62 = vsel %vm1008_vm0, %v1390_v54, %v1392_v52  ;;  %v1294_v63 = vmax.f32 %v1292_v5, %v1293_v6 }
 0x38f   :  { %v1727_v55 = vpack.c.bf16 %v1393_v62, %v1391_v33 }
 0x390   :  { %v1295_v10 = vrot.slane %v1294_v63, 1 }
 0x391   :  { %1729 = vmatprep.subr.msk.bf16.mxu0 %vm1728_vm13, %v1727_v55 }
 0x392   :  { %1732 = vmatpush3.bf16.xpose.msk.msra.mxu0 %vm1728_vm13, %v1727_v55  ;;  %v1296_v57 = vmax.f32 %v1294_v63, %v1295_v10 }
 0x393   :  { %1678 = vmatprep.subr.msk.mxu0 %vm951_vm1, %v1392_v52 }
 0x394   :  { %v1297_v11 = vsub.f32 %v1284_v40, %v1296_v57  ;;  %v1298_v56 = vsub.f32 %v1285_v45, %v1296_v57 }
 0x396   :  { %v1299_v59 = vmul.f32 1.442695, %v1297_v11  ;;  %v1301_v58 = vmul.f32 1.442695, %v1298_v56 }
 0x398   :  { %1925 = vpow2.f32 %v1299_v59 }
 0x399   :  { %1927 = vpow2.f32 %v1301_v58 }
 0x39a   :  { %1679 = vmatpush3.xpose.msk.msra.mxu0 %vm951_vm1, %v1392_v52 }
 0x39d   :  { %1681 = vmatmul.mubr.msk.f32.vlgmr.msra.gmra.mrb[8].mxu0 %vm951_vm1, %v1619_v24 }
 0x3a2   :  { %v1926_v60 = vpop.eup %1925 }
 0x3a3   :  { %v1928_v19 = vpop.eup %1927  ;;  %v1303_v61 = vsel %vm1286_vm11, %v1926_v60, 0.0 }
 0x3a4   :  { %v1304_v0 = vsel %vm1288_vm12, %v1928_v19, 0.0 }
 0x3a5   :  { %v1305_v1 = vadd.f32 %v1304_v0, %v1303_v61 }
 0x3a7   :  { %v1306_v2 = vrot.slane %v1305_v1, 4 }
 0x3a9   :  { %v1307_v20 = vadd.f32 %v1306_v2, %v1305_v1 }
 0x3ab   :  { %v1308_v3 = vrot.slane %v1307_v20, 2 }
 0x3ad   :  { %v1309_v4 = vadd.f32 %v1308_v3, %v1307_v20 }
 0x3af   :  { %v1310_v43 = vrot.slane %v1309_v4, 1 }
 0x3b1   :  { %v1311_v7 = vadd.f32 %v1310_v43, %v1309_v4 }
 0x3b3   :  { %1929 = vrcp.f32 %v1311_v7 }
 0x3bd   :  { %v1930_v8 = vpop.eup %1929 }
 0x3be   :  { %v1314_v44 = vmul.f32 %v1930_v8, %v1928_v19  ;;  %v1313_v9 = vmul.f32 %v1930_v8, %v1926_v60 }
 0x3c0   :  { %v1316_v12 = vadd.f32 0.001, %v1314_v44  ;;  %v1315_v13 = vadd.f32 0.001, %v1313_v9 }
 0x3c2   :  { %1931 = vlog2.f32 %v1316_v12 }
 0x3c3   :  { %1933 = vlog2.f32 %v1315_v13 }
 0x3cc   :  { %v1932_v14 = vpop.eup %1931 }
 0x3cd   :  { %v1934_v17 = vpop.eup %1933  ;;  %v1320_v15 = vmul.f32 0.6931472, %v1932_v14 }
 0x3ce   :  { %v1318_v16 = vmul.f32 0.6931472, %v1934_v17 }
 0x3cf   :  { %v1322_v18 = vmul.f32 %v1320_v15, %v1314_v44 }
 0x3d0   :  { %v1321_v21 = vmul.f32 %v1318_v16, %v1313_v9 }
 0x3d1   :  { %v1324_v22 = vsel %vm1288_vm12, %v1322_v18, 0.0 }
 0x3d2   :  { %v1323_v23 = vsel %vm1286_vm11, %v1321_v21, 0.0 }
 0x3d3   :  { %v1325_v30 = vadd.f32 %v1324_v22, %v1323_v23 }
 0x3d5   :  { %v1326_v24 = vrot.slane %v1325_v30, 4 }
 0x3d7   :  { %v1327_v25 = vadd.f32 %v1326_v24, %v1325_v30 }
 0x3d9   :  { %v1328_v28 = vrot.slane %v1327_v25, 2 }
 0x3db   :  { %v1329_v26 = vadd.f32 %v1328_v28, %v1327_v25 }
 0x3dd   :  { %v1330_v27 = vrot.slane %v1329_v26, 1 }
 0x3df   :  { %v1331_v31 = vadd.f32 %v1330_v27, %v1329_v26 }
 0x3e1   :  { %v1332_v34 = vsub.f32 0.0, %v1331_v31 }
 0x3e3   :  { %v1333_v37 = vmax.f32 %v1332_v34, 0.0 }
 0x3e5   :  { %v1504_v38 = vadd.f32 1.0, %v1333_v37 }
 0x3e7   :  { %1935 = vrcp.f32 %v1504_v38 }
 0x3f1   :  { %v1936_v29 = vpop.eup %1935 }
 0x3f2   :  { %v1506_v39 = vmul.f32 %v1936_v29, %v1313_v9  ;;  %v1507_v40 = vmul.f32 %v1936_v29, %v1314_v44 }
 0x470   :  { %v1682_v41 = vpop.f32.mrb[8].mxu0 }
 0x471   :  { %v1482_v45 = vadd.f32 0.001, %v1682_v41  ;;  %v1472_v46 = vpop.f32.mrb[9].mxu0 }
 0x472   :  { %v1481_v49 = vadd.f32 0.001, %v1472_v46 }
 0x473   :  { %1937 = vlog2.f32 %v1482_v45 }
 0x474   :  { %1939 = vlog2.f32 %v1481_v49 }
 0x47d   :  { %v1938_v50 = vpop.eup %1937 }
 0x47e   :  { %v1940_v42 = vpop.eup %1939  ;;  %v1486_v47 = vmul.f32 0.6931472, %v1938_v50 }
 0x47f   :  { %v1484_v48 = vmul.f32 0.6931472, %v1940_v42 }
 0x480   :  { %v1488_v35 = vmul.f32 %v1682_v41, %v1486_v47 }
 0x481   :  { %v1487_v36 = vmul.f32 %v1484_v48, %v1472_v46 }
 0x482   :  { %v1490_v53 = vsel %vm1288_vm12, %v1488_v35, 0.0 }
 0x483   :  { %v1489_v54 = vsel %vm1286_vm11, %v1487_v36, 0.0 }
 0x484   :  { %v1491_v51 = vadd.f32 %v1490_v53, %v1489_v54 }
 0x486   :  { %v1492_v5 = vrot.slane %v1491_v51, 4 }
 0x488   :  { %v1493_v32 = vadd.f32 %v1492_v5, %v1491_v51 }
 0x48a   :  { %v1494_v52 = vrot.slane %v1493_v32, 2 }
 0x48c   :  { %v1495_v6 = vadd.f32 %v1494_v52, %v1493_v32 }
 0x48e   :  { %v1496_v33 = vrot.slane %v1495_v6, 1 }
 0x490   :  { %v1497_v62 = vadd.f32 %v1496_v33, %v1495_v6 }
 0x492   :  { %v1498_v63 = vsub.f32 0.0, %v1497_v62 }
 0x494   :  { %v1499_v55 = vmax.f32 %v1498_v63, 0.0 }
 0x496   :  { %v1500_v10 = vadd.f32 1.0, %v1499_v55 }
 0x498   :  { %1941 = vrcp.f32 %v1500_v10 }
 0x4a2   :  { %v1942_v57 = vpop.eup %1941 }
 0x4a3   :  { %v1502_v11 = vmul.f32 %v1942_v57, %v1472_v46  ;;  %v1503_v56 = vmul.f32 %v1942_v57, %v1682_v41 }
 0x4a5   :  { %v1508_v59 = vadd.f32 %v1506_v39, %v1502_v11  ;;  %v1509_v58 = vadd.f32 %v1507_v40, %v1503_v56 }
 0x4a7   :  { %1510 = vst.msk [vmem:[%s2397_s6] sm:$0xff] %vm1286_vm11, %v1508_v59 }
 0x4a8   :  { %1511 = vst.msk [vmem:[%s2397_s6 + $0x8] sm:$0x3] %vm1288_vm12, %v1509_v58 }
 0x4a9   :  { %1520 = vsyncpa [#allocation3], 1 }

</bundles_post_ra>
